<compile_context>
chip_gen: v5e
topology: v5e:2x2
jax: 0.10.0
libtpu: 0.0.40
codegen_flags: <defaults>
</compile_context>

<pallas_src>
import jax
import jax.numpy as jnp
from jax.experimental import pallas as pl
from jax.experimental.pallas import tpu as pltpu

LOG_SIG_MAX = 2.0
LOG_SIG_MIN = -20.0


def _round_up(x, m):
    return ((x + m - 1) // m) * m


def _gaussian_policy_kernel(state_ref, w1_ref, w2_ref, wh_ref, b12_ref, bh_ref,
                            out_ref):
    x = state_ref[...]                                        # [TB, num_inputs]

    # linear1 + relu
    h1 = jnp.dot(x, w1_ref[...], preferred_element_type=jnp.float32)
    h1 = jnp.maximum(h1 + b12_ref[0:1, :], 0.0)               # [TB, hidden]

    # linear2 + relu
    h2 = jnp.dot(h1, w2_ref[...], preferred_element_type=jnp.float32)
    h2 = jnp.maximum(h2 + b12_ref[1:2, :], 0.0)               # [TB, hidden]

    # fused mean|log_std head: one matmul, one lane-dense store
    head = jnp.dot(h2, wh_ref[...], preferred_element_type=jnp.float32)
    head = head + bh_ref[...]                                 # [TB, 2*A]

    a = head.shape[-1] // 2
    col = jax.lax.broadcasted_iota(jnp.int32, head.shape, dimension=1)
    clipped = jnp.clip(head, LOG_SIG_MIN, LOG_SIG_MAX)
    out = jnp.where(col < a, head, clipped)                   # clamp log_std half only
    out_ref[...] = out.astype(out_ref.dtype)


@jax.jit
def gaussian_policy_forward(state, params):
    """Returns (mean, log_std), matching GaussianPolicy.forward."""
    B, num_inputs = state.shape
    hidden = params["w1"].shape[1]
    A = params["wm"].shape[1]

    # --- operand fusion (one-time, folded by XLA under jit) ---
    wh = jnp.concatenate([params["wm"], params["wls"]], axis=1)   # [hidden, 2A]
    bh = jnp.concatenate([params["bm"], params["bls"]], axis=1)   # [1, 2A]
    b12 = jnp.concatenate([params["b1"], params["b2"]], axis=0)   # [2, hidden]

    # --- batch tiling: 8-aligned tile, pad B up to a multiple of it ---
    TB = min(512, _round_up(B, 8))
    Bp = _round_up(B, TB)
    state_p = state if Bp == B else jnp.pad(state, ((0, Bp - B), (0, 0)))

    in_specs = [
        pl.BlockSpec((TB, num_inputs), lambda i: (i, 0)),         # state tiles
        pl.BlockSpec((num_inputs, hidden), lambda i: (0, 0)),     # weights stay
        pl.BlockSpec((hidden, hidden), lambda i: (0, 0)),         #  VMEM-resident
        pl.BlockSpec((hidden, 2 * A), lambda i: (0, 0)),
        pl.BlockSpec((2, hidden), lambda i: (0, 0)),
        pl.BlockSpec((1, 2 * A), lambda i: (0, 0)),
    ]
    out_spec = pl.BlockSpec((TB, 2 * A), lambda i: (i, 0))
    out_shape = jax.ShapeDtypeStruct((Bp, 2 * A), jnp.float32)

    fused = pl.pallas_call(
        _gaussian_policy_kernel,
        out_shape=out_shape,
        grid=(Bp // TB,),
        in_specs=in_specs,
        out_specs=out_spec,
        compiler_params=pltpu.CompilerParams(
            dimension_semantics=("parallel",)),
    )(state_p, params["w1"], params["w2"], wh, b12, bh)

    mean = fused[:B, :A]
    log_std = fused[:B, A:]
    return mean, log_std


def init_params(key, num_inputs, num_actions, hidden_dim):
    """Xavier-uniform weights (gain=1), zero biases — matches weights_init_."""
    def xavier(k, fan_in, fan_out):
        limit = jnp.sqrt(6.0 / (fan_in + fan_out))
        # stored as [in, out] (transpose of PyTorch's [out, in]) for x @ W
        return jax.random.uniform(k, (fan_in, fan_out), jnp.float32, -limit, limit)

    k1, k2, k3, k4 = jax.random.split(key, 4)
    return {
        "w1":  xavier(k1, num_inputs, hidden_dim),
        "b1":  jnp.zeros((1, hidden_dim), jnp.float32),
        "w2":  xavier(k2, hidden_dim, hidden_dim),
        "b2":  jnp.zeros((1, hidden_dim), jnp.float32),
        "wm":  xavier(k3, hidden_dim, num_actions),
        "bm":  jnp.zeros((1, num_actions), jnp.float32),
        "wls": xavier(k4, hidden_dim, num_actions),
        "bls": jnp.zeros((1, num_actions), jnp.float32),
    }


def _reference_forward(state, p):
    h1 = jnp.maximum(state @ p["w1"] + p["b1"], 0.0)
    h2 = jnp.maximum(h1 @ p["w2"] + p["b2"], 0.0)
    mean = h2 @ p["wm"] + p["bm"]
    log_std = jnp.clip(h2 @ p["wls"] + p["bls"], LOG_SIG_MIN, LOG_SIG_MAX)
    return mean, log_std


if __name__ == "__main__":
    key = jax.random.PRNGKey(0)
    k_state, k_params = jax.random.split(key)

    batch = 2
    num_inputs = 8
    num_actions = 4
    hidden_dim = 32

    state = jax.random.normal(k_state, (batch, num_inputs), jnp.float32)
    params = init_params(k_params, num_inputs, num_actions, hidden_dim)

    mean, log_std = gaussian_policy_forward(state, params)
    jax.block_until_ready((mean, log_std))

    ref_mean, ref_log_std = _reference_forward(state, params)
    assert mean.shape == (batch, num_actions)
    assert log_std.shape == (batch, num_actions)
    assert jnp.allclose(mean, ref_mean, atol=1e-5, rtol=1e-5)
    assert jnp.allclose(log_std, ref_log_std, atol=1e-5, rtol=1e-5)

    # TODO(synk): GaussianPolicy.sample() (rsample + tanh squash + log_prob) is
    # stochastic glue around this forward; only forward() is kernelized here.

    print("KERNEL_OK")
</pallas_src>

<mosaic_0001>
module attributes {stable_mosaic.version = 11 : i64} {
  func.func @_gaussian_policy_kernel(%arg0: i32, %arg1: memref<8x8xf32, #tpu.memory_space<vmem>>, %arg2: memref<8x32xf32, #tpu.memory_space<vmem>>, %arg3: memref<32x32xf32, #tpu.memory_space<vmem>>, %arg4: memref<32x8xf32, #tpu.memory_space<vmem>>, %arg5: memref<2x32xf32, #tpu.memory_space<vmem>>, %arg6: memref<1x8xf32, #tpu.memory_space<vmem>>, %arg7: memref<8x8xf32, #tpu.memory_space<vmem>>) attributes {dimension_semantics = [#tpu.dimension_semantics<parallel>], iteration_bounds = array<i64: 1>, scalar_prefetch = 0 : i64, scratch_operands = 0 : i64, tpu.core_type = #tpu.core_type<tc>, window_params = [{transform_indices = @transform_0, window_bounds = array<i64: 8, 8>}, {pipeline_mode = #tpu.pipeline_mode<synchronous>, transform_indices = @transform_1, window_bounds = array<i64: 8, 32>}, {pipeline_mode = #tpu.pipeline_mode<synchronous>, transform_indices = @transform_2, window_bounds = array<i64: 32, 32>}, {pipeline_mode = #tpu.pipeline_mode<synchronous>, transform_indices = @transform_3, window_bounds = array<i64: 32, 8>}, {pipeline_mode = #tpu.pipeline_mode<synchronous>, transform_indices = @transform_4, window_bounds = array<i64: 2, 32>}, {pipeline_mode = #tpu.pipeline_mode<synchronous>, transform_indices = @transform_5, window_bounds = array<i64: 1, 8>}, {transform_indices = @transform_6, window_bounds = array<i64: 8, 8>}]} {
    %c0 = arith.constant 0 : index
    %c0_0 = arith.constant 0 : index
    %0 = vector.load %arg1[%c0, %c0_0] : memref<8x8xf32, #tpu.memory_space<vmem>>, vector<8x8xf32>
    %c0_1 = arith.constant 0 : index
    %c0_2 = arith.constant 0 : index
    %1 = vector.load %arg2[%c0_1, %c0_2] : memref<8x32xf32, #tpu.memory_space<vmem>>, vector<8x32xf32>
    %cst = arith.constant dense<0.000000e+00> : vector<8x32xf32>
    %2 = tpu.matmul %0, %1, %cst {dimension_numbers = #tpu.dot_dimension_numbers<[1], [0], [0], [1], [0, 0, 1, 1], [], []>} : vector<8x8xf32>, vector<8x32xf32>, vector<8x32xf32> -> vector<8x32xf32>
    %c0_3 = arith.constant 0 : index
    %c0_4 = arith.constant 0 : index
    %3 = vector.load %arg5[%c0_3, %c0_4] : memref<2x32xf32, #tpu.memory_space<vmem>>, vector<1x32xf32>
    %4 = vector.broadcast %3 : vector<1x32xf32> to vector<8x32xf32>
    %5 = arith.addf %2, %4 : vector<8x32xf32>
    %cst_5 = arith.constant 0.000000e+00 : f32
    %6 = vector.broadcast %cst_5 : f32 to vector<8x32xf32>
    %7 = arith.maximumf %5, %6 : vector<8x32xf32>
    %c0_6 = arith.constant 0 : index
    %c0_7 = arith.constant 0 : index
    %8 = vector.load %arg3[%c0_6, %c0_7] : memref<32x32xf32, #tpu.memory_space<vmem>>, vector<32x32xf32>
    %cst_8 = arith.constant dense<0.000000e+00> : vector<8x32xf32>
    %9 = tpu.matmul %7, %8, %cst_8 {dimension_numbers = #tpu.dot_dimension_numbers<[1], [0], [0], [1], [0, 0, 1, 1], [], []>} : vector<8x32xf32>, vector<32x32xf32>, vector<8x32xf32> -> vector<8x32xf32>
    %c1 = arith.constant 1 : index
    %c0_9 = arith.constant 0 : index
    %10 = vector.load %arg5[%c1, %c0_9] : memref<2x32xf32, #tpu.memory_space<vmem>>, vector<1x32xf32>
    %11 = vector.broadcast %10 : vector<1x32xf32> to vector<8x32xf32>
    %12 = arith.addf %9, %11 : vector<8x32xf32>
    %cst_10 = arith.constant 0.000000e+00 : f32
    %13 = vector.broadcast %cst_10 : f32 to vector<8x32xf32>
    %14 = arith.maximumf %12, %13 : vector<8x32xf32>
    %c0_11 = arith.constant 0 : index
    %c0_12 = arith.constant 0 : index
    %15 = vector.load %arg4[%c0_11, %c0_12] : memref<32x8xf32, #tpu.memory_space<vmem>>, vector<32x8xf32>
    %cst_13 = arith.constant dense<0.000000e+00> : vector<8x8xf32>
    %16 = tpu.matmul %14, %15, %cst_13 {dimension_numbers = #tpu.dot_dimension_numbers<[1], [0], [0], [1], [0, 0, 1, 1], [], []>} : vector<8x32xf32>, vector<32x8xf32>, vector<8x8xf32> -> vector<8x8xf32>
    %c0_14 = arith.constant 0 : index
    %c0_15 = arith.constant 0 : index
    %17 = vector.load %arg6[%c0_14, %c0_15] : memref<1x8xf32, #tpu.memory_space<vmem>>, vector<1x8xf32>
    %18 = vector.broadcast %17 : vector<1x8xf32> to vector<8x8xf32>
    %19 = arith.addf %16, %18 : vector<8x8xf32>
    %20 = tpu.iota {dimensions = array<i32: 1>} : vector<8x8xi32>
    %cst_16 = arith.constant -2.000000e+01 : f32
    %cst_17 = arith.constant 2.000000e+00 : f32
    %21 = vector.broadcast %cst_16 : f32 to vector<8x8xf32>
    %22 = arith.maximumf %21, %19 : vector<8x8xf32>
    %23 = vector.broadcast %cst_17 : f32 to vector<8x8xf32>
    %24 = arith.minimumf %23, %22 : vector<8x8xf32>
    %c4_i32 = arith.constant 4 : i32
    %25 = vector.broadcast %c4_i32 : i32 to vector<8x8xi32>
    %26 = arith.cmpi slt, %20, %25 : vector<8x8xi32>
    %27 = arith.select %26, %19, %24 : vector<8x8xi1>, vector<8x8xf32>
    %c0_18 = arith.constant 0 : index
    %c0_19 = arith.constant 0 : index
    %28 = vector.load %arg7[%c0_18, %c0_19] : memref<8x8xf32, #tpu.memory_space<vmem>>, vector<8x8xf32>
    tpu.vector_store %arg7[%c0_18, %c0_19], %27 {strides = array<i32>} : memref<8x8xf32, #tpu.memory_space<vmem>>, vector<8x8xf32>,
    return
  }
  func.func @transform_0(%arg0: i32) -> (i32, i32) {
    %c0_i32 = arith.constant 0 : i32
    %c0_i32_0 = arith.constant 0 : i32
    return %arg0, %c0_i32 : i32, i32
  }
  func.func @transform_1(%arg0: i32) -> (i32, i32) {
    %c0_i32 = arith.constant 0 : i32
    %c0_i32_0 = arith.constant 0 : i32
    %c0_i32_1 = arith.constant 0 : i32
    return %c0_i32, %c0_i32_0 : i32, i32
  }
  func.func @transform_2(%arg0: i32) -> (i32, i32) {
    %c0_i32 = arith.constant 0 : i32
    %c0_i32_0 = arith.constant 0 : i32
    %c0_i32_1 = arith.constant 0 : i32
    return %c0_i32, %c0_i32_0 : i32, i32
  }
  func.func @transform_3(%arg0: i32) -> (i32, i32) {
    %c0_i32 = arith.constant 0 : i32
    %c0_i32_0 = arith.constant 0 : i32
    %c0_i32_1 = arith.constant 0 : i32
    return %c0_i32, %c0_i32_0 : i32, i32
  }
  func.func @transform_4(%arg0: i32) -> (i32, i32) {
    %c0_i32 = arith.constant 0 : i32
    %c0_i32_0 = arith.constant 0 : i32
    %c0_i32_1 = arith.constant 0 : i32
    return %c0_i32, %c0_i32_0 : i32, i32
  }
  func.func @transform_5(%arg0: i32) -> (i32, i32) {
    %c0_i32 = arith.constant 0 : i32
    %c0_i32_0 = arith.constant 0 : i32
    %c0_i32_1 = arith.constant 0 : i32
    return %c0_i32, %c0_i32_0 : i32, i32
  }
  func.func @transform_6(%arg0: i32) -> (i32, i32) {
    %c0_i32 = arith.constant 0 : i32
    %c0_i32_0 = arith.constant 0 : i32
    return %arg0, %c0_i32 : i32, i32
  }
}

</mosaic_0001>

<bundles_post_ra>
// kernel: gaussian_policy_forward.1
= control target key start
LH: loop header
LB: loop body
LE: loop exit
PB: predicated region body
PF: predicated region fallthrough
CT: control target
= control target key end

     0   :  { %vm27_vm0 = vcmask 64512   ;;  %vm58_vm1 = vcmask 261120   ;;  %v114_v18 = vlaneseq  ;;  %s210_s1 = inlined_call_operand.vmem [shape: f32[8,32], index: 1, kind: input, shape index: {}]   ;;  %s211_s0 = inlined_call_operand.vmem [shape: f32[8,8], index: 0, kind: input, shape index: {}]   ;;  %s212_s2 = inlined_call_operand.vmem [shape: f32[32,32], index: 2, kind: input, shape index: {}]   ;;  %s213_s4 = inlined_call_operand.vmem [shape: f32[2,32], index: 4, kind: input, shape index: {}]   ;;  %s214_s3 = inlined_call_operand.vmem [shape: f32[32,8], index: 3, kind: input, shape index: {}]   ;;  %s215_s5 = inlined_call_operand.vmem [shape: f32[1,8], index: 5, kind: input, shape index: {}]   ;;  %s216_s6 = inlined_call_operand.vmem [shape: f32[8,8], index: 6, kind: output, shape index: {}]  }
   0x1   :  { %v24_v0 = vld [vmem:[%s210_s1] sm:$0xff]  ;;  %v55_v2 = vld [vmem:[%s212_s2 + $0x18] sm:$0xff]  ;;  %v54_v3 = vld [vmem:[%s212_s2 + $0x10] sm:$0xff] }
   0x2   :  { %v23_v1 = vld [vmem:[%s211_s0] sm:$0xff]  ;;  %46 = vmatpush.msra.mxu0 %v24_v0  ;;  %74 = vmatpush.msra.mxu1 %v55_v2  ;;  %v53_v4 = vld [vmem:[%s212_s2 + $0x8] sm:$0xff]  ;;  %v86_v6 = vld [vmem:[%s214_s3 + $0x18] sm:$0xff]  ;;  %v115_v21 = vand.u32 127, %v114_v18 }
   0x3   :  { %125 = vmatmul.msk.f32.vlgmr.msra.gmra.mxu0 %vm27_vm0, %v23_v1  ;;  %v52_v5 = vld [vmem:[%s212_s2] sm:$0xff]  ;;  %106 = vmatpush.msra.mxu2 %v86_v6  ;;  %v85_v11 = vld [vmem:[%s214_s3 + $0x10] sm:$0xff]  ;;  %v84_v12 = vld [vmem:[%s214_s3 + $0x8] sm:$0xff] }
   0x4   :  { %75 = vmatpush.msra.mxu1 %v54_v3  ;;  %v128_v7 = vld [vmem:[%s213_s4] ss:$0 sm:$0xff]  ;;  %v129_v14 = vld [vmem:[%s213_s4 + $0x1] ss:$0 sm:$0xff]  ;;  %vm118_vm2 = vcmp.lt.s32.totalorder %v115_v21, 4 }
   0x5   :  { %107 = vmatpush.msra.mxu2 %v85_v11  ;;  %v83_v13 = vld [vmem:[%s214_s3] sm:$0xff] }
   0x6   :  { %76 = vmatpush.msra.mxu1 %v53_v4  ;;  %v130_v19 = vld [vmem:[%s215_s5] ss:$0 sm:$0xff] }
   0x7   :  { %108 = vmatpush.msra.mxu2 %v84_v12 }
   0x8   :  { %77 = vmatpush.msra.mxu1 %v52_v5 }
   0x9   :  { %109 = vmatpush.msra.mxu2 %v83_v13 }
  0x80   :  { %v48_v8 = vpop.f32.mrf.mxu0 }
  0x81   :  { %v49_v9 = vadd.f32 %v128_v7, %v48_v8 }
  0x83   :  { %v51_v10 = vmax.f32 %v49_v9, 0.0 }
  0x85   :  { %126 = vmatmul.msk.f32.vlgmr.msra.gmra.mxu1 %vm58_vm1, %v51_v10 }
 0x102   :  { %v79_v15 = vpop.f32.mrf.mxu1 }
 0x103   :  { %v80_v16 = vadd.f32 %v129_v14, %v79_v15 }
 0x105   :  { %v82_v17 = vmax.f32 %v80_v16, 0.0 }
 0x107   :  { %127 = vmatmul.msk.f32.vlgmr.msra.gmra.mxu2 %vm58_vm1, %v82_v17 }
 0x18a   :  { %v111_v20 = vpop.f32.mrf.mxu2 }
 0x18b   :  { %v112_v22 = vadd.f32 %v130_v19, %v111_v20 }
 0x18d   :  { %v116_v23 = vmax.f32 %v112_v22, -20.0 }
 0x18f   :  { %v117_v24 = vmin.f32 %v116_v23, 2.0 }
 0x191   :  { %v119_v25 = vsel %vm118_vm2, %v112_v22, %v117_v24 }
 0x192   :  { %120 = vst.msk [vmem:[%s216_s6] sm:$0xff] %vm27_vm0, %v119_v25 }

</bundles_post_ra>
